<compile_context>
chip_gen: v5e
topology: v5e:2x2
jax: 0.10.0
libtpu: 0.0.40
codegen_flags: <defaults>
</compile_context>

<pallas_src>
import functools
import math

import jax
import jax.numpy as jnp
from jax.experimental import pallas as pl
from jax.experimental.pallas import tpu as pltpu


def _layer_norm(x, gamma, beta, eps):
    # One-pass variance: var = E[x^2] - E[x]^2 (halves the cross-lane reductions).
    mu = jnp.mean(x, axis=-1, keepdims=True)
    var = jnp.mean(x * x, axis=-1, keepdims=True) - mu * mu
    return (x - mu) * jax.lax.rsqrt(var + eps) * gamma + beta


def encoder_kernel(
    x_ref,            # (S, D)   f32  current batch element (batch dim squeezed)
    wqkv_ref,         # (L, D, 3D) bf16
    bqkv_ref,         # (L, 1, 3D) f32
    wo_ref,           # (L, D, D)  bf16
    w1_ref,           # (L, D, F)  bf16
    b1_ref,           # (L, 1, F)  f32
    w2_ref,           # (L, F, D)  bf16
    vecs_ref,         # (L, 6, D)  f32  [bo, gamma1, beta1, b2, gamma2, beta2]
    o_ref,            # (S, D)
    *, num_layers: int, num_heads: int, eps: float,
):
    f32 = jnp.float32
    bf16 = jnp.bfloat16
    x = x_ref[...].astype(f32)                  # (S, D)
    S, D = x.shape
    dh = D // num_heads
    scale = 1.0 / math.sqrt(dh)

    # TODO(synk): enc_pad_mask support (mask is None in this configuration, so no masking).
    for l in range(num_layers):                 # static loop over fused layers
        vecs = vecs_ref[l]                      # (6, D) f32
        bo, g1, be1 = vecs[0:1], vecs[1:2], vecs[2:3]
        b2, g2, be2 = vecs[3:4], vecs[4:5], vecs[5:6]

        # ---- fused QKV projection: one (S, D) @ (D, 3D) matmul ----
        qkv = jnp.dot(x.astype(bf16), wqkv_ref[l],
                      preferred_element_type=f32) + bqkv_ref[l]
        q = qkv[:, 0:D]
        k = qkv[:, D:2 * D]
        v = qkv[:, 2 * D:3 * D]

        # ---- per-head attention with the output projection folded in ----
        wo_l = wo_ref[l]                        # (D, D) bf16, loaded once per layer
        attn_out = jnp.zeros((S, D), f32)
        for h in range(num_heads):
            lo, hi = h * dh, (h + 1) * dh
            qh = q[:, lo:hi].astype(bf16)
            kh = k[:, lo:hi].astype(bf16)
            vh = v[:, lo:hi].astype(bf16)
            s = jnp.dot(qh, kh.T, preferred_element_type=f32) * scale
            s = s - jnp.max(s, axis=-1, keepdims=True)
            p = jnp.exp(s)
            p = p * pl.reciprocal(jnp.sum(p, axis=-1, keepdims=True), approx=True)
            ctx_h = jnp.dot(p.astype(bf16), vh, preferred_element_type=f32)
            # (P V_h) @ Wo_rows_h accumulated in f32 — no lane-axis concat, no scratch.
            attn_out = attn_out + jnp.dot(ctx_h.astype(bf16), wo_l[lo:hi, :],
                                          preferred_element_type=f32)
        attn_out = attn_out + bo

        # residual + norm1 (post-norm)
        x1 = _layer_norm(x + attn_out, g1, be1, eps)

        # ---- feed-forward: Linear -> ReLU -> Linear ----
        h1 = jnp.dot(x1.astype(bf16), w1_ref[l],
                     preferred_element_type=f32) + b1_ref[l]
        h1 = jnp.maximum(h1, 0.0)
        ff = jnp.dot(h1.astype(bf16), w2_ref[l],
                     preferred_element_type=f32) + b2

        # residual + norm2
        x = _layer_norm(x1 + ff, g2, be2, eps)

    o_ref[...] = x.astype(o_ref.dtype)


def encoder(x, params, *, num_heads: int, eps: float):
    B, S, D = x.shape
    L = params["wqkv"].shape[0]
    F = params["w1"].shape[2]

    bf16 = jnp.bfloat16
    # Pre-cast weight matrices to bf16: halves weight DMA bytes, removes in-kernel casts.
    wqkv = params["wqkv"].astype(bf16)
    wo = params["wo"].astype(bf16)
    w1 = params["w1"].astype(bf16)
    w2 = params["w2"].astype(bf16)

    def full(shape):
        # Constant block index across the grid -> weights DMA'd to VMEM only once.
        return pl.BlockSpec(shape, lambda b: (0,) * len(shape))

    in_specs = [
        pl.BlockSpec((None, S, D), lambda b: (b, 0, 0)),   # x, batch dim squeezed
        full((L, D, 3 * D)),                               # wqkv (bf16)
        full((L, 1, 3 * D)),                               # bqkv (f32)
        full((L, D, D)),                                   # wo   (bf16)
        full((L, D, F)),                                   # w1   (bf16)
        full((L, 1, F)),                                   # b1   (f32)
        full((L, F, D)),                                   # w2   (bf16)
        full((L, 6, D)),                                   # packed bo/g1/be1/b2/g2/be2
    ]

    kernel = functools.partial(
        encoder_kernel, num_layers=L, num_heads=num_heads, eps=eps)

    return pl.pallas_call(
        kernel,
        out_shape=jax.ShapeDtypeStruct((B, S, D), x.dtype),
        grid_spec=pltpu.PrefetchScalarGridSpec(
            num_scalar_prefetch=0,
            grid=(B,),
            in_specs=in_specs,
            out_specs=pl.BlockSpec((None, S, D), lambda b: (b, 0, 0)),
        ),
        compiler_params=pltpu.CompilerParams(dimension_semantics=("parallel",)),
    )(
        x,
        wqkv, params["bqkv"], wo,
        w1, params["b1"], w2,
        params["vecs"],
    )


def _init_layer(key, embed_dim, ff_dim):
    D, F = embed_dim, ff_dim
    ks = jax.random.split(key, 6)
    s_in = 1.0 / math.sqrt(D)
    s_ff2 = 1.0 / math.sqrt(F)
    u = lambda k, shape, s: jax.random.uniform(k, shape, jnp.float32, -s, s)

    wq = u(ks[0], (D, D), s_in)
    wk = u(ks[1], (D, D), s_in)
    wv = u(ks[2], (D, D), s_in)
    wqkv = jnp.concatenate([wq, wk, wv], axis=1)          # (D, 3D)
    bqkv = jnp.zeros((1, 3 * D), jnp.float32)
    wo = u(ks[3], (D, D), s_in)
    w1 = u(ks[4], (D, F), s_in)
    b1 = jnp.zeros((1, F), jnp.float32)
    w2 = u(ks[5], (F, D), s_ff2)
    # packed vectors: [bo, gamma1, beta1, b2, gamma2, beta2]
    vecs = jnp.stack([
        jnp.zeros((D,), jnp.float32),   # bo
        jnp.ones((D,), jnp.float32),    # gamma1
        jnp.zeros((D,), jnp.float32),   # beta1
        jnp.zeros((D,), jnp.float32),   # b2
        jnp.ones((D,), jnp.float32),    # gamma2
        jnp.zeros((D,), jnp.float32),   # beta2
    ], axis=0)                                            # (6, D)
    return {"wqkv": wqkv, "bqkv": bqkv, "wo": wo,
            "w1": w1, "b1": b1, "w2": w2, "vecs": vecs}


def init_encoder_params(key, num_layers, embed_dim, ff_dim):
    layer_keys = jax.random.split(key, num_layers)
    per_layer = [_init_layer(k, embed_dim, ff_dim) for k in layer_keys]
    # Stack each parameter along a leading layer axis.
    return {name: jnp.stack([p[name] for p in per_layer], axis=0)
            for name in per_layer[0]}


if __name__ == "__main__":
    # Small shapes consistent with the module:
    # batch=2, seq=8, embed_dim=32, ff_shape=[64], num_heads=2, num_layers=2
    B, S, D, F = 2, 8, 32, 64
    NUM_HEADS, NUM_LAYERS, EPS = 2, 2, 1e-6

    key = jax.random.PRNGKey(0)
    key, xk = jax.random.split(key)
    x = jax.random.normal(xk, (B, S, D), jnp.float32)

    params = init_encoder_params(key, NUM_LAYERS, D, F)

    out = encoder(x, params, num_heads=NUM_HEADS, eps=EPS)
    out = jax.block_until_ready(out)
    assert out.shape == (B, S, D)
    assert bool(jnp.all(jnp.isfinite(out)))
    print("KERNEL_OK")
</pallas_src>

<mosaic_0001>
module attributes {stable_mosaic.version = 11 : i64} {
  func.func @encoder_kernel(%arg0: i32, %arg1: memref<1x8x32xf32, #tpu.memory_space<vmem>>, %arg2: memref<2x32x96xbf16, #tpu.memory_space<vmem>>, %arg3: memref<2x1x96xf32, #tpu.memory_space<vmem>>, %arg4: memref<2x32x32xbf16, #tpu.memory_space<vmem>>, %arg5: memref<2x32x64xbf16, #tpu.memory_space<vmem>>, %arg6: memref<2x1x64xf32, #tpu.memory_space<vmem>>, %arg7: memref<2x64x32xbf16, #tpu.memory_space<vmem>>, %arg8: memref<2x6x32xf32, #tpu.memory_space<vmem>>, %arg9: memref<1x8x32xf32, #tpu.memory_space<vmem>>) attributes {dimension_semantics = [#tpu.dimension_semantics<parallel>], iteration_bounds = array<i64: 2>, scalar_prefetch = 0 : i64, scratch_operands = 0 : i64, tpu.core_type = #tpu.core_type<tc>, window_params = [{transform_indices = @transform_0, window_bounds = array<i64: 1, 8, 32>}, {pipeline_mode = #tpu.pipeline_mode<synchronous>, transform_indices = @transform_1, window_bounds = array<i64: 2, 32, 96>}, {pipeline_mode = #tpu.pipeline_mode<synchronous>, transform_indices = @transform_2, window_bounds = array<i64: 2, 1, 96>}, {pipeline_mode = #tpu.pipeline_mode<synchronous>, transform_indices = @transform_3, window_bounds = array<i64: 2, 32, 32>}, {pipeline_mode = #tpu.pipeline_mode<synchronous>, transform_indices = @transform_4, window_bounds = array<i64: 2, 32, 64>}, {pipeline_mode = #tpu.pipeline_mode<synchronous>, transform_indices = @transform_5, window_bounds = array<i64: 2, 1, 64>}, {pipeline_mode = #tpu.pipeline_mode<synchronous>, transform_indices = @transform_6, window_bounds = array<i64: 2, 64, 32>}, {pipeline_mode = #tpu.pipeline_mode<synchronous>, transform_indices = @transform_7, window_bounds = array<i64: 2, 6, 32>}, {transform_indices = @transform_8, window_bounds = array<i64: 1, 8, 32>}]} {
    %c0 = arith.constant 0 : index
    %c0_0 = arith.constant 0 : index
    %c0_1 = arith.constant 0 : index
    %0 = vector.load %arg1[%c0, %c0_0, %c0_1] : memref<1x8x32xf32, #tpu.memory_space<vmem>>, vector<1x8x32xf32>
    %1 = vector.shape_cast %0 : vector<1x8x32xf32> to vector<8x32xf32>
    %c0_2 = arith.constant 0 : index
    %c0_3 = arith.constant 0 : index
    %c0_4 = arith.constant 0 : index
    %2 = vector.load %arg8[%c0_2, %c0_3, %c0_4] : memref<2x6x32xf32, #tpu.memory_space<vmem>>, vector<1x6x32xf32>
    %3 = vector.shape_cast %2 : vector<1x6x32xf32> to vector<6x32xf32>
    %4 = vector.extract_strided_slice %3 {offsets = [0, 0], sizes = [1, 32], strides = [1, 1]} : vector<6x32xf32> to vector<1x32xf32>
    %5 = vector.extract_strided_slice %3 {offsets = [1, 0], sizes = [1, 32], strides = [1, 1]} : vector<6x32xf32> to vector<1x32xf32>
    %6 = vector.extract_strided_slice %3 {offsets = [2, 0], sizes = [1, 32], strides = [1, 1]} : vector<6x32xf32> to vector<1x32xf32>
    %7 = vector.extract_strided_slice %3 {offsets = [3, 0], sizes = [1, 32], strides = [1, 1]} : vector<6x32xf32> to vector<1x32xf32>
    %8 = vector.extract_strided_slice %3 {offsets = [4, 0], sizes = [1, 32], strides = [1, 1]} : vector<6x32xf32> to vector<1x32xf32>
    %9 = vector.extract_strided_slice %3 {offsets = [5, 0], sizes = [1, 32], strides = [1, 1]} : vector<6x32xf32> to vector<1x32xf32>
    %10 = arith.truncf %1 : vector<8x32xf32> to vector<8x32xbf16>
    %c0_5 = arith.constant 0 : index
    %c0_6 = arith.constant 0 : index
    %c0_7 = arith.constant 0 : index
    %11 = vector.load %arg2[%c0_5, %c0_6, %c0_7] : memref<2x32x96xbf16, #tpu.memory_space<vmem>>, vector<1x32x96xbf16>
    %12 = vector.shape_cast %11 : vector<1x32x96xbf16> to vector<32x96xbf16>
    %cst = arith.constant dense<0.000000e+00> : vector<8x96xf32>
    %13 = tpu.matmul %10, %12, %cst {dimension_numbers = #tpu.dot_dimension_numbers<[1], [0], [0], [1], [0, 0, 1, 1], [], []>} : vector<8x32xbf16>, vector<32x96xbf16>, vector<8x96xf32> -> vector<8x96xf32>
    %c0_8 = arith.constant 0 : index
    %c0_9 = arith.constant 0 : index
    %c0_10 = arith.constant 0 : index
    %14 = vector.load %arg3[%c0_8, %c0_9, %c0_10] : memref<2x1x96xf32, #tpu.memory_space<vmem>>, vector<1x1x96xf32>
    %15 = vector.shape_cast %14 : vector<1x1x96xf32> to vector<1x96xf32>
    %16 = vector.broadcast %15 : vector<1x96xf32> to vector<8x96xf32>
    %17 = arith.addf %13, %16 : vector<8x96xf32>
    %18 = vector.extract_strided_slice %17 {offsets = [0, 0], sizes = [8, 32], strides = [1, 1]} : vector<8x96xf32> to vector<8x32xf32>
    %19 = vector.extract_strided_slice %17 {offsets = [0, 32], sizes = [8, 32], strides = [1, 1]} : vector<8x96xf32> to vector<8x32xf32>
    %20 = vector.extract_strided_slice %17 {offsets = [0, 64], sizes = [8, 32], strides = [1, 1]} : vector<8x96xf32> to vector<8x32xf32>
    %c0_11 = arith.constant 0 : index
    %c0_12 = arith.constant 0 : index
    %c0_13 = arith.constant 0 : index
    %21 = vector.load %arg4[%c0_11, %c0_12, %c0_13] : memref<2x32x32xbf16, #tpu.memory_space<vmem>>, vector<1x32x32xbf16>
    %22 = vector.shape_cast %21 : vector<1x32x32xbf16> to vector<32x32xbf16>
    %cst_14 = arith.constant 0.000000e+00 : f32
    %23 = vector.broadcast %cst_14 : f32 to vector<8x32xf32>
    %24 = vector.extract_strided_slice %18 {offsets = [0, 0], sizes = [8, 16], strides = [1, 1]} : vector<8x32xf32> to vector<8x16xf32>
    %25 = arith.truncf %24 : vector<8x16xf32> to vector<8x16xbf16>
    %26 = vector.extract_strided_slice %19 {offsets = [0, 0], sizes = [8, 16], strides = [1, 1]} : vector<8x32xf32> to vector<8x16xf32>
    %27 = arith.truncf %26 : vector<8x16xf32> to vector<8x16xbf16>
    %28 = vector.extract_strided_slice %20 {offsets = [0, 0], sizes = [8, 16], strides = [1, 1]} : vector<8x32xf32> to vector<8x16xf32>
    %29 = arith.truncf %28 : vector<8x16xf32> to vector<8x16xbf16>
    %30 = tpu.transpose %27, [1, 0] : vector<8x16xbf16> -> vector<16x8xbf16>
    %cst_15 = arith.constant dense<0.000000e+00> : vector<8x8xf32>
    %31 = tpu.matmul %25, %30, %cst_15 {dimension_numbers = #tpu.dot_dimension_numbers<[1], [0], [0], [1], [0, 0, 1, 1], [], []>} : vector<8x16xbf16>, vector<16x8xbf16>, vector<8x8xf32> -> vector<8x8xf32>
    %cst_16 = arith.constant 2.500000e-01 : f32
    %32 = vector.broadcast %cst_16 : f32 to vector<8x8xf32>
    %33 = arith.mulf %31, %32 : vector<8x8xf32>
    %cst_17 = arith.constant dense<0xFF800000> : vector<8xf32>
    %34 = vector.multi_reduction <maximumf>, %33, %cst_17 [1] : vector<8x8xf32> to vector<8xf32>
    %35 = vector.shape_cast %34 : vector<8xf32> to vector<8x1xf32>
    %36 = vector.broadcast %35 : vector<8x1xf32> to vector<8x8xf32>
    %37 = arith.subf %33, %36 : vector<8x8xf32>
    %38 = math.exp %37 : vector<8x8xf32>
    %cst_18 = arith.constant dense<0.000000e+00> : vector<8xf32>
    %39 = vector.multi_reduction <add>, %38, %cst_18 [1] : vector<8x8xf32> to vector<8xf32>
    %40 = vector.shape_cast %39 : vector<8xf32> to vector<8x1xf32>
    %41 = tpu.reciprocal %40 {approx = true} : vector<8x1xf32> -> vector<8x1xf32>
    %42 = vector.broadcast %41 : vector<8x1xf32> to vector<8x8xf32>
    %43 = arith.mulf %38, %42 : vector<8x8xf32>
    %44 = arith.truncf %43 : vector<8x8xf32> to vector<8x8xbf16>
    %cst_19 = arith.constant dense<0.000000e+00> : vector<8x16xf32>
    %45 = tpu.matmul %44, %29, %cst_19 {dimension_numbers = #tpu.dot_dimension_numbers<[1], [0], [0], [1], [0, 0, 1, 1], [], []>} : vector<8x8xbf16>, vector<8x16xbf16>, vector<8x16xf32> -> vector<8x16xf32>
    %46 = arith.truncf %45 : vector<8x16xf32> to vector<8x16xbf16>
    %47 = vector.extract_strided_slice %22 {offsets = [0, 0], sizes = [16, 32], strides = [1, 1]} : vector<32x32xbf16> to vector<16x32xbf16>
    %cst_20 = arith.constant dense<0.000000e+00> : vector<8x32xf32>
    %48 = tpu.matmul %46, %47, %cst_20 {dimension_numbers = #tpu.dot_dimension_numbers<[1], [0], [0], [1], [0, 0, 1, 1], [], []>} : vector<8x16xbf16>, vector<16x32xbf16>, vector<8x32xf32> -> vector<8x32xf32>
    %49 = arith.addf %23, %48 : vector<8x32xf32>
    %50 = vector.extract_strided_slice %18 {offsets = [0, 16], sizes = [8, 16], strides = [1, 1]} : vector<8x32xf32> to vector<8x16xf32>
    %51 = arith.truncf %50 : vector<8x16xf32> to vector<8x16xbf16>
    %52 = vector.extract_strided_slice %19 {offsets = [0, 16], sizes = [8, 16], strides = [1, 1]} : vector<8x32xf32> to vector<8x16xf32>
    %53 = arith.truncf %52 : vector<8x16xf32> to vector<8x16xbf16>
    %54 = vector.extract_strided_slice %20 {offsets = [0, 16], sizes = [8, 16], strides = [1, 1]} : vector<8x32xf32> to vector<8x16xf32>
    %55 = arith.truncf %54 : vector<8x16xf32> to vector<8x16xbf16>
    %56 = tpu.transpose %53, [1, 0] : vector<8x16xbf16> -> vector<16x8xbf16>
    %cst_21 = arith.constant dense<0.000000e+00> : vector<8x8xf32>
    %57 = tpu.matmul %51, %56, %cst_21 {dimension_numbers = #tpu.dot_dimension_numbers<[1], [0], [0], [1], [0, 0, 1, 1], [], []>} : vector<8x16xbf16>, vector<16x8xbf16>, vector<8x8xf32> -> vector<8x8xf32>
    %cst_22 = arith.constant 2.500000e-01 : f32
    %58 = vector.broadcast %cst_22 : f32 to vector<8x8xf32>
    %59 = arith.mulf %57, %58 : vector<8x8xf32>
    %cst_23 = arith.constant dense<0xFF800000> : vector<8xf32>
    %60 = vector.multi_reduction <maximumf>, %59, %cst_23 [1] : vector<8x8xf32> to vector<8xf32>
    %61 = vector.shape_cast %60 : vector<8xf32> to vector<8x1xf32>
    %62 = vector.broadcast %61 : vector<8x1xf32> to vector<8x8xf32>
    %63 = arith.subf %59, %62 : vector<8x8xf32>
    %64 = math.exp %63 : vector<8x8xf32>
    %cst_24 = arith.constant dense<0.000000e+00> : vector<8xf32>
    %65 = vector.multi_reduction <add>, %64, %cst_24 [1] : vector<8x8xf32> to vector<8xf32>
    %66 = vector.shape_cast %65 : vector<8xf32> to vector<8x1xf32>
    %67 = tpu.reciprocal %66 {approx = true} : vector<8x1xf32> -> vector<8x1xf32>
    %68 = vector.broadcast %67 : vector<8x1xf32> to vector<8x8xf32>
    %69 = arith.mulf %64, %68 : vector<8x8xf32>
    %70 = arith.truncf %69 : vector<8x8xf32> to vector<8x8xbf16>
    %cst_25 = arith.constant dense<0.000000e+00> : vector<8x16xf32>
    %71 = tpu.matmul %70, %55, %cst_25 {dimension_numbers = #tpu.dot_dimension_numbers<[1], [0], [0], [1], [0, 0, 1, 1], [], []>} : vector<8x8xbf16>, vector<8x16xbf16>, vector<8x16xf32> -> vector<8x16xf32>
    %72 = arith.truncf %71 : vector<8x16xf32> to vector<8x16xbf16>
    %73 = vector.extract_strided_slice %22 {offsets = [16, 0], sizes = [16, 32], strides = [1, 1]} : vector<32x32xbf16> to vector<16x32xbf16>
    %cst_26 = arith.constant dense<0.000000e+00> : vector<8x32xf32>
    %74 = tpu.matmul %72, %73, %cst_26 {dimension_numbers = #tpu.dot_dimension_numbers<[1], [0], [0], [1], [0, 0, 1, 1], [], []>} : vector<8x16xbf16>, vector<16x32xbf16>, vector<8x32xf32> -> vector<8x32xf32>
    %75 = arith.addf %49, %74 : vector<8x32xf32>
    %76 = vector.broadcast %4 : vector<1x32xf32> to vector<8x32xf32>
    %77 = arith.addf %75, %76 : vector<8x32xf32>
    %78 = arith.addf %1, %77 : vector<8x32xf32>
    %cst_27 = arith.constant dense<0.000000e+00> : vector<8xf32>
    %79 = vector.multi_reduction <add>, %78, %cst_27 [1] : vector<8x32xf32> to vector<8xf32>
    %80 = vector.shape_cast %79 : vector<8xf32> to vector<8x1xf32>
    %cst_28 = arith.constant 3.200000e+01 : f32
    %81 = vector.broadcast %cst_28 : f32 to vector<8x1xf32>
    %82 = arith.divf %80, %81 : vector<8x1xf32>
    %83 = arith.mulf %78, %78 : vector<8x32xf32>
    %cst_29 = arith.constant dense<0.000000e+00> : vector<8xf32>
    %84 = vector.multi_reduction <add>, %83, %cst_29 [1] : vector<8x32xf32> to vector<8xf32>
    %85 = vector.shape_cast %84 : vector<8xf32> to vector<8x1xf32>
    %cst_30 = arith.constant 3.200000e+01 : f32
    %86 = vector.broadcast %cst_30 : f32 to vector<8x1xf32>
    %87 = arith.divf %85, %86 : vector<8x1xf32>
    %88 = arith.mulf %82, %82 : vector<8x1xf32>
    %89 = arith.subf %87, %88 : vector<8x1xf32>
    %90 = vector.broadcast %82 : vector<8x1xf32> to vector<8x32xf32>
    %91 = arith.subf %78, %90 : vector<8x32xf32>
    %cst_31 = arith.constant 9.99999997E-7 : f32
    %92 = vector.broadcast %cst_31 : f32 to vector<8x1xf32>
    %93 = arith.addf %89, %92 : vector<8x1xf32>
    %94 = math.rsqrt %93 : vector<8x1xf32>
    %95 = vector.broadcast %94 : vector<8x1xf32> to vector<8x32xf32>
    %96 = arith.mulf %91, %95 : vector<8x32xf32>
    %97 = vector.broadcast %5 : vector<1x32xf32> to vector<8x32xf32>
    %98 = arith.mulf %96, %97 : vector<8x32xf32>
    %99 = vector.broadcast %6 : vector<1x32xf32> to vector<8x32xf32>
    %100 = arith.addf %98, %99 : vector<8x32xf32>
    %101 = arith.truncf %100 : vector<8x32xf32> to vector<8x32xbf16>
    %c0_32 = arith.constant 0 : index
    %c0_33 = arith.constant 0 : index
    %c0_34 = arith.constant 0 : index
    %102 = vector.load %arg5[%c0_32, %c0_33, %c0_34] : memref<2x32x64xbf16, #tpu.memory_space<vmem>>, vector<1x32x64xbf16>
    %103 = vector.shape_cast %102 : vector<1x32x64xbf16> to vector<32x64xbf16>
    %cst_35 = arith.constant dense<0.000000e+00> : vector<8x64xf32>
    %104 = tpu.matmul %101, %103, %cst_35 {dimension_numbers = #tpu.dot_dimension_numbers<[1], [0], [0], [1], [0, 0, 1, 1], [], []>} : vector<8x32xbf16>, vector<32x64xbf16>, vector<8x64xf32> -> vector<8x64xf32>
    %c0_36 = arith.constant 0 : index
    %c0_37 = arith.constant 0 : index
    %c0_38 = arith.constant 0 : index
    %105 = vector.load %arg6[%c0_36, %c0_37, %c0_38] : memref<2x1x64xf32, #tpu.memory_space<vmem>>, vector<1x1x64xf32>
    %106 = vector.shape_cast %105 : vector<1x1x64xf32> to vector<1x64xf32>
    %107 = vector.broadcast %106 : vector<1x64xf32> to vector<8x64xf32>
    %108 = arith.addf %104, %107 : vector<8x64xf32>
    %cst_39 = arith.constant 0.000000e+00 : f32
    %109 = vector.broadcast %cst_39 : f32 to vector<8x64xf32>
    %110 = arith.maximumf %108, %109 : vector<8x64xf32>
    %111 = arith.truncf %110 : vector<8x64xf32> to vector<8x64xbf16>
    %c0_40 = arith.constant 0 : index
    %c0_41 = arith.constant 0 : index
    %c0_42 = arith.constant 0 : index
    %112 = vector.load %arg7[%c0_40, %c0_41, %c0_42] : memref<2x64x32xbf16, #tpu.memory_space<vmem>>, vector<1x64x32xbf16>
    %113 = vector.shape_cast %112 : vector<1x64x32xbf16> to vector<64x32xbf16>
    %cst_43 = arith.constant dense<0.000000e+00> : vector<8x32xf32>
    %114 = tpu.matmul %111, %113, %cst_43 {dimension_numbers = #tpu.dot_dimension_numbers<[1], [0], [0], [1], [0, 0, 1, 1], [], []>} : vector<8x64xbf16>, vector<64x32xbf16>, vector<8x32xf32> -> vector<8x32xf32>
    %115 = vector.broadcast %7 : vector<1x32xf32> to vector<8x32xf32>
    %116 = arith.addf %114, %115 : vector<8x32xf32>
    %117 = arith.addf %100, %116 : vector<8x32xf32>
    %cst_44 = arith.constant dense<0.000000e+00> : vector<8xf32>
    %118 = vector.multi_reduction <add>, %117, %cst_44 [1] : vector<8x32xf32> to vector<8xf32>
    %119 = vector.shape_cast %118 : vector<8xf32> to vector<8x1xf32>
    %cst_45 = arith.constant 3.200000e+01 : f32
    %120 = vector.broadcast %cst_45 : f32 to vector<8x1xf32>
    %121 = arith.divf %119, %120 : vector<8x1xf32>
    %122 = arith.mulf %117, %117 : vector<8x32xf32>
    %cst_46 = arith.constant dense<0.000000e+00> : vector<8xf32>
    %123 = vector.multi_reduction <add>, %122, %cst_46 [1] : vector<8x32xf32> to vector<8xf32>
    %124 = vector.shape_cast %123 : vector<8xf32> to vector<8x1xf32>
    %cst_47 = arith.constant 3.200000e+01 : f32
    %125 = vector.broadcast %cst_47 : f32 to vector<8x1xf32>
    %126 = arith.divf %124, %125 : vector<8x1xf32>
    %127 = arith.mulf %121, %121 : vector<8x1xf32>
    %128 = arith.subf %126, %127 : vector<8x1xf32>
    %129 = vector.broadcast %121 : vector<8x1xf32> to vector<8x32xf32>
    %130 = arith.subf %117, %129 : vector<8x32xf32>
    %cst_48 = arith.constant 9.99999997E-7 : f32
    %131 = vector.broadcast %cst_48 : f32 to vector<8x1xf32>
    %132 = arith.addf %128, %131 : vector<8x1xf32>
    %133 = math.rsqrt %132 : vector<8x1xf32>
    %134 = vector.broadcast %133 : vector<8x1xf32> to vector<8x32xf32>
    %135 = arith.mulf %130, %134 : vector<8x32xf32>
    %136 = vector.broadcast %8 : vector<1x32xf32> to vector<8x32xf32>
    %137 = arith.mulf %135, %136 : vector<8x32xf32>
    %138 = vector.broadcast %9 : vector<1x32xf32> to vector<8x32xf32>
    %139 = arith.addf %137, %138 : vector<8x32xf32>
    %c1 = arith.constant 1 : index
    %c0_49 = arith.constant 0 : index
    %c0_50 = arith.constant 0 : index
    %140 = vector.load %arg8[%c1, %c0_49, %c0_50] : memref<2x6x32xf32, #tpu.memory_space<vmem>>, vector<1x6x32xf32>
    %141 = vector.shape_cast %140 : vector<1x6x32xf32> to vector<6x32xf32>
    %142 = vector.extract_strided_slice %141 {offsets = [0, 0], sizes = [1, 32], strides = [1, 1]} : vector<6x32xf32> to vector<1x32xf32>
    %143 = vector.extract_strided_slice %141 {offsets = [1, 0], sizes = [1, 32], strides = [1, 1]} : vector<6x32xf32> to vector<1x32xf32>
    %144 = vector.extract_strided_slice %141 {offsets = [2, 0], sizes = [1, 32], strides = [1, 1]} : vector<6x32xf32> to vector<1x32xf32>
    %145 = vector.extract_strided_slice %141 {offsets = [3, 0], sizes = [1, 32], strides = [1, 1]} : vector<6x32xf32> to vector<1x32xf32>
    %146 = vector.extract_strided_slice %141 {offsets = [4, 0], sizes = [1, 32], strides = [1, 1]} : vector<6x32xf32> to vector<1x32xf32>
    %147 = vector.extract_strided_slice %141 {offsets = [5, 0], sizes = [1, 32], strides = [1, 1]} : vector<6x32xf32> to vector<1x32xf32>
    %148 = arith.truncf %139 : vector<8x32xf32> to vector<8x32xbf16>
    %c1_51 = arith.constant 1 : index
    %c0_52 = arith.constant 0 : index
    %c0_53 = arith.constant 0 : index
    %149 = vector.load %arg2[%c1_51, %c0_52, %c0_53] : memref<2x32x96xbf16, #tpu.memory_space<vmem>>, vector<1x32x96xbf16>
    %150 = vector.shape_cast %149 : vector<1x32x96xbf16> to vector<32x96xbf16>
    %cst_54 = arith.constant dense<0.000000e+00> : vector<8x96xf32>
    %151 = tpu.matmul %148, %150, %cst_54 {dimension_numbers = #tpu.dot_dimension_numbers<[1], [0], [0], [1], [0, 0, 1, 1], [], []>} : vector<8x32xbf16>, vector<32x96xbf16>, vector<8x96xf32> -> vector<8x96xf32>
    %c1_55 = arith.constant 1 : index
    %c0_56 = arith.constant 0 : index
    %c0_57 = arith.constant 0 : index
    %152 = vector.load %arg3[%c1_55, %c0_56, %c0_57] : memref<2x1x96xf32, #tpu.memory_space<vmem>>, vector<1x1x96xf32>
    %153 = vector.shape_cast %152 : vector<1x1x96xf32> to vector<1x96xf32>
    %154 = vector.broadcast %153 : vector<1x96xf32> to vector<8x96xf32>
    %155 = arith.addf %151, %154 : vector<8x96xf32>
    %156 = vector.extract_strided_slice %155 {offsets = [0, 0], sizes = [8, 32], strides = [1, 1]} : vector<8x96xf32> to vector<8x32xf32>
    %157 = vector.extract_strided_slice %155 {offsets = [0, 32], sizes = [8, 32], strides = [1, 1]} : vector<8x96xf32> to vector<8x32xf32>
    %158 = vector.extract_strided_slice %155 {offsets = [0, 64], sizes = [8, 32], strides = [1, 1]} : vector<8x96xf32> to vector<8x32xf32>
    %c1_58 = arith.constant 1 : index
    %c0_59 = arith.constant 0 : index
    %c0_60 = arith.constant 0 : index
    %159 = vector.load %arg4[%c1_58, %c0_59, %c0_60] : memref<2x32x32xbf16, #tpu.memory_space<vmem>>, vector<1x32x32xbf16>
    %160 = vector.shape_cast %159 : vector<1x32x32xbf16> to vector<32x32xbf16>
    %cst_61 = arith.constant 0.000000e+00 : f32
    %161 = vector.broadcast %cst_61 : f32 to vector<8x32xf32>
    %162 = vector.extract_strided_slice %156 {offsets = [0, 0], sizes = [8, 16], strides = [1, 1]} : vector<8x32xf32> to vector<8x16xf32>
    %163 = arith.truncf %162 : vector<8x16xf32> to vector<8x16xbf16>
    %164 = vector.extract_strided_slice %157 {offsets = [0, 0], sizes = [8, 16], strides = [1, 1]} : vector<8x32xf32> to vector<8x16xf32>
    %165 = arith.truncf %164 : vector<8x16xf32> to vector<8x16xbf16>
    %166 = vector.extract_strided_slice %158 {offsets = [0, 0], sizes = [8, 16], strides = [1, 1]} : vector<8x32xf32> to vector<8x16xf32>
    %167 = arith.truncf %166 : vector<8x16xf32> to vector<8x16xbf16>
    %168 = tpu.transpose %165, [1, 0] : vector<8x16xbf16> -> vector<16x8xbf16>
    %cst_62 = arith.constant dense<0.000000e+00> : vector<8x8xf32>
    %169 = tpu.matmul %163, %168, %cst_62 {dimension_numbers = #tpu.dot_dimension_numbers<[1], [0], [0], [1], [0, 0, 1, 1], [], []>} : vector<8x16xbf16>, vector<16x8xbf16>, vector<8x8xf32> -> vector<8x8xf32>
    %cst_63 = arith.constant 2.500000e-01 : f32
    %170 = vector.broadcast %cst_63 : f32 to vector<8x8xf32>
    %171 = arith.mulf %169, %170 : vector<8x8xf32>
    %cst_64 = arith.constant dense<0xFF800000> : vector<8xf32>
    %172 = vector.multi_reduction <maximumf>, %171, %cst_64 [1] : vector<8x8xf32> to vector<8xf32>
    %173 = vector.shape_cast %172 : vector<8xf32> to vector<8x1xf32>
    %174 = vector.broadcast %173 : vector<8x1xf32> to vector<8x8xf32>
    %175 = arith.subf %171, %174 : vector<8x8xf32>
    %176 = math.exp %175 : vector<8x8xf32>
    %cst_65 = arith.constant dense<0.000000e+00> : vector<8xf32>
    %177 = vector.multi_reduction <add>, %176, %cst_65 [1] : vector<8x8xf32> to vector<8xf32>
    %178 = vector.shape_cast %177 : vector<8xf32> to vector<8x1xf32>
    %179 = tpu.reciprocal %178 {approx = true} : vector<8x1xf32> -> vector<8x1xf32>
    %180 = vector.broadcast %179 : vector<8x1xf32> to vector<8x8xf32>
    %181 = arith.mulf %176, %180 : vector<8x8xf32>
    %182 = arith.truncf %181 : vector<8x8xf32> to vector<8x8xbf16>
    %cst_66 = arith.constant dense<0.000000e+00> : vector<8x16xf32>
    %183 = tpu.matmul %182, %167, %cst_66 {dimension_numbers = #tpu.dot_dimension_numbers<[1], [0], [0], [1], [0, 0, 1, 1], [], []>} : vector<8x8xbf16>, vector<8x16xbf16>, vector<8x16xf32> -> vector<8x16xf32>
    %184 = arith.truncf %183 : vector<8x16xf32> to vector<8x16xbf16>
    %185 = vector.extract_strided_slice %160 {offsets = [0, 0], sizes = [16, 32], strides = [1, 1]} : vector<32x32xbf16> to vector<16x32xbf16>
    %cst_67 = arith.constant dense<0.000000e+00> : vector<8x32xf32>
    %186 = tpu.matmul %184, %185, %cst_67 {dimension_numbers = #tpu.dot_dimension_numbers<[1], [0], [0], [1], [0, 0, 1, 1], [], []>} : vector<8x16xbf16>, vector<16x32xbf16>, vector<8x32xf32> -> vector<8x32xf32>
    %187 = arith.addf %161, %186 : vector<8x32xf32>
    %188 = vector.extract_strided_slice %156 {offsets = [0, 16], sizes = [8, 16], strides = [1, 1]} : vector<8x32xf32> to vector<8x16xf32>
    %189 = arith.truncf %188 : vector<8x16xf32> to vector<8x16xbf16>
    %190 = vector.extract_strided_slice %157 {offsets = [0, 16], sizes = [8, 16], strides = [1, 1]} : vector<8x32xf32> to vector<8x16xf32>
    %191 = arith.truncf %190 : vector<8x16xf32> to vector<8x16xbf16>
    %192 = vector.extract_strided_slice %158 {offsets = [0, 16], sizes = [8, 16], strides = [1, 1]} : vector<8x32xf32> to vector<8x16xf32>
    %193 = arith.truncf %192 : vector<8x16xf32> to vector<8x16xbf16>
    %194 = tpu.transpose %191, [1, 0] : vector<8x16xbf16> -> vector<16x8xbf16>
    %cst_68 = arith.constant dense<0.000000e+00> : vector<8x8xf32>
    %195 = tpu.matmul %189, %194, %cst_68 {dimension_numbers = #tpu.dot_dimension_numbers<[1], [0], [0], [1], [0, 0, 1, 1], [], []>} : vector<8x16xbf16>, vector<16x8xbf16>, vector<8x8xf32> -> vector<8x8xf32>
    %cst_69 = arith.constant 2.500000e-01 : f32
    %196 = vector.broadcast %cst_69 : f32 to vector<8x8xf32>
    %197 = arith.mulf %195, %196 : vector<8x8xf32>
    %cst_70 = arith.constant dense<0xFF800000> : vector<8xf32>
    %198 = vector.multi_reduction <maximumf>, %197, %cst_70 [1] : vector<8x8xf32> to vector<8xf32>
    %199 = vector.shape_cast %198 : vector<8xf32> to vector<8x1xf32>
    %200 = vector.broadcast %199 : vector<8x1xf32> to vector<8x8xf32>
    %201 = arith.subf %197, %200 : vector<8x8xf32>
    %202 = math.exp %201 : vector<8x8xf32>
    %cst_71 = arith.constant dense<0.000000e+00> : vector<8xf32>
    %203 = vector.multi_reduction <add>, %202, %cst_71 [1] : vector<8x8xf32> to vector<8xf32>
    %204 = vector.shape_cast %203 : vector<8xf32> to vector<8x1xf32>
    %205 = tpu.reciprocal %204 {approx = true} : vector<8x1xf32> -> vector<8x1xf32>
    %206 = vector.broadcast %205 : vector<8x1xf32> to vector<8x8xf32>
    %207 = arith.mulf %202, %206 : vector<8x8xf32>
    %208 = arith.truncf %207 : vector<8x8xf32> to vector<8x8xbf16>
    %cst_72 = arith.constant dense<0.000000e+00> : vector<8x16xf32>
    %209 = tpu.matmul %208, %193, %cst_72 {dimension_numbers = #tpu.dot_dimension_numbers<[1], [0], [0], [1], [0, 0, 1, 1], [], []>} : vector<8x8xbf16>, vector<8x16xbf16>, vector<8x16xf32> -> vector<8x16xf32>
    %210 = arith.truncf %209 : vector<8x16xf32> to vector<8x16xbf16>
    %211 = vector.extract_strided_slice %160 {offsets = [16, 0], sizes = [16, 32], strides = [1, 1]} : vector<32x32xbf16> to vector<16x32xbf16>
    %cst_73 = arith.constant dense<0.000000e+00> : vector<8x32xf32>
    %212 = tpu.matmul %210, %211, %cst_73 {dimension_numbers = #tpu.dot_dimension_numbers<[1], [0], [0], [1], [0, 0, 1, 1], [], []>} : vector<8x16xbf16>, vector<16x32xbf16>, vector<8x32xf32> -> vector<8x32xf32>
    %213 = arith.addf %187, %212 : vector<8x32xf32>
    %214 = vector.broadcast %142 : vector<1x32xf32> to vector<8x32xf32>
    %215 = arith.addf %213, %214 : vector<8x32xf32>
    %216 = arith.addf %139, %215 : vector<8x32xf32>
    %cst_74 = arith.constant dense<0.000000e+00> : vector<8xf32>
    %217 = vector.multi_reduction <add>, %216, %cst_74 [1] : vector<8x32xf32> to vector<8xf32>
    %218 = vector.shape_cast %217 : vector<8xf32> to vector<8x1xf32>
    %cst_75 = arith.constant 3.200000e+01 : f32
    %219 = vector.broadcast %cst_75 : f32 to vector<8x1xf32>
    %220 = arith.divf %218, %219 : vector<8x1xf32>
    %221 = arith.mulf %216, %216 : vector<8x32xf32>
    %cst_76 = arith.constant dense<0.000000e+00> : vector<8xf32>
    %222 = vector.multi_reduction <add>, %221, %cst_76 [1] : vector<8x32xf32> to vector<8xf32>
    %223 = vector.shape_cast %222 : vector<8xf32> to vector<8x1xf32>
    %cst_77 = arith.constant 3.200000e+01 : f32
    %224 = vector.broadcast %cst_77 : f32 to vector<8x1xf32>
    %225 = arith.divf %223, %224 : vector<8x1xf32>
    %226 = arith.mulf %220, %220 : vector<8x1xf32>
    %227 = arith.subf %225, %226 : vector<8x1xf32>
    %228 = vector.broadcast %220 : vector<8x1xf32> to vector<8x32xf32>
    %229 = arith.subf %216, %228 : vector<8x32xf32>
    %cst_78 = arith.constant 9.99999997E-7 : f32
    %230 = vector.broadcast %cst_78 : f32 to vector<8x1xf32>
    %231 = arith.addf %227, %230 : vector<8x1xf32>
    %232 = math.rsqrt %231 : vector<8x1xf32>
    %233 = vector.broadcast %232 : vector<8x1xf32> to vector<8x32xf32>
    %234 = arith.mulf %229, %233 : vector<8x32xf32>
    %235 = vector.broadcast %143 : vector<1x32xf32> to vector<8x32xf32>
    %236 = arith.mulf %234, %235 : vector<8x32xf32>
    %237 = vector.broadcast %144 : vector<1x32xf32> to vector<8x32xf32>
    %238 = arith.addf %236, %237 : vector<8x32xf32>
    %239 = arith.truncf %238 : vector<8x32xf32> to vector<8x32xbf16>
    %c1_79 = arith.constant 1 : index
    %c0_80 = arith.constant 0 : index
    %c0_81 = arith.constant 0 : index
    %240 = vector.load %arg5[%c1_79, %c0_80, %c0_81] : memref<2x32x64xbf16, #tpu.memory_space<vmem>>, vector<1x32x64xbf16>
    %241 = vector.shape_cast %240 : vector<1x32x64xbf16> to vector<32x64xbf16>
    %cst_82 = arith.constant dense<0.000000e+00> : vector<8x64xf32>
    %242 = tpu.matmul %239, %241, %cst_82 {dimension_numbers = #tpu.dot_dimension_numbers<[1], [0], [0], [1], [0, 0, 1, 1], [], []>} : vector<8x32xbf16>, vector<32x64xbf16>, vector<8x64xf32> -> vector<8x64xf32>
    %c1_83 = arith.constant 1 : index
    %c0_84 = arith.constant 0 : index
    %c0_85 = arith.constant 0 : index
    %243 = vector.load %arg6[%c1_83, %c0_84, %c0_85] : memref<2x1x64xf32, #tpu.memory_space<vmem>>, vector<1x1x64xf32>
    %244 = vector.shape_cast %243 : vector<1x1x64xf32> to vector<1x64xf32>
    %245 = vector.broadcast %244 : vector<1x64xf32> to vector<8x64xf32>
    %246 = arith.addf %242, %245 : vector<8x64xf32>
    %cst_86 = arith.constant 0.000000e+00 : f32
    %247 = vector.broadcast %cst_86 : f32 to vector<8x64xf32>
    %248 = arith.maximumf %246, %247 : vector<8x64xf32>
    %249 = arith.truncf %248 : vector<8x64xf32> to vector<8x64xbf16>
    %c1_87 = arith.constant 1 : index
    %c0_88 = arith.constant 0 : index
    %c0_89 = arith.constant 0 : index
    %250 = vector.load %arg7[%c1_87, %c0_88, %c0_89] : memref<2x64x32xbf16, #tpu.memory_space<vmem>>, vector<1x64x32xbf16>
    %251 = vector.shape_cast %250 : vector<1x64x32xbf16> to vector<64x32xbf16>
    %cst_90 = arith.constant dense<0.000000e+00> : vector<8x32xf32>
    %252 = tpu.matmul %249, %251, %cst_90 {dimension_numbers = #tpu.dot_dimension_numbers<[1], [0], [0], [1], [0, 0, 1, 1], [], []>} : vector<8x64xbf16>, vector<64x32xbf16>, vector<8x32xf32> -> vector<8x32xf32>
    %253 = vector.broadcast %145 : vector<1x32xf32> to vector<8x32xf32>
    %254 = arith.addf %252, %253 : vector<8x32xf32>
    %255 = arith.addf %238, %254 : vector<8x32xf32>
    %cst_91 = arith.constant dense<0.000000e+00> : vector<8xf32>
    %256 = vector.multi_reduction <add>, %255, %cst_91 [1] : vector<8x32xf32> to vector<8xf32>
    %257 = vector.shape_cast %256 : vector<8xf32> to vector<8x1xf32>
    %cst_92 = arith.constant 3.200000e+01 : f32
    %258 = vector.broadcast %cst_92 : f32 to vector<8x1xf32>
    %259 = arith.divf %257, %258 : vector<8x1xf32>
    %260 = arith.mulf %255, %255 : vector<8x32xf32>
    %cst_93 = arith.constant dense<0.000000e+00> : vector<8xf32>
    %261 = vector.multi_reduction <add>, %260, %cst_93 [1] : vector<8x32xf32> to vector<8xf32>
    %262 = vector.shape_cast %261 : vector<8xf32> to vector<8x1xf32>
    %cst_94 = arith.constant 3.200000e+01 : f32
    %263 = vector.broadcast %cst_94 : f32 to vector<8x1xf32>
    %264 = arith.divf %262, %263 : vector<8x1xf32>
    %265 = arith.mulf %259, %259 : vector<8x1xf32>
    %266 = arith.subf %264, %265 : vector<8x1xf32>
    %267 = vector.broadcast %259 : vector<8x1xf32> to vector<8x32xf32>
    %268 = arith.subf %255, %267 : vector<8x32xf32>
    %cst_95 = arith.constant 9.99999997E-7 : f32
    %269 = vector.broadcast %cst_95 : f32 to vector<8x1xf32>
    %270 = arith.addf %266, %269 : vector<8x1xf32>
    %271 = math.rsqrt %270 : vector<8x1xf32>
    %272 = vector.broadcast %271 : vector<8x1xf32> to vector<8x32xf32>
    %273 = arith.mulf %268, %272 : vector<8x32xf32>
    %274 = vector.broadcast %146 : vector<1x32xf32> to vector<8x32xf32>
    %275 = arith.mulf %273, %274 : vector<8x32xf32>
    %276 = vector.broadcast %147 : vector<1x32xf32> to vector<8x32xf32>
    %277 = arith.addf %275, %276 : vector<8x32xf32>
    %c0_96 = arith.constant 0 : index
    %c0_97 = arith.constant 0 : index
    %c0_98 = arith.constant 0 : index
    %278 = vector.load %arg9[%c0_96, %c0_97, %c0_98] : memref<1x8x32xf32, #tpu.memory_space<vmem>>, vector<1x8x32xf32>
    %279 = vector.shape_cast %278 : vector<1x8x32xf32> to vector<8x32xf32>
    %280 = vector.shape_cast %277 : vector<8x32xf32> to vector<1x8x32xf32>
    tpu.vector_store %arg9[%c0_96, %c0_97, %c0_98], %280 {strides = array<i32>} : memref<1x8x32xf32, #tpu.memory_space<vmem>>, vector<1x8x32xf32>,
    return
  }
  func.func @transform_0(%arg0: i32) -> (i32, i32, i32) {
    %c0_i32 = arith.constant 0 : i32
    %c0_i32_0 = arith.constant 0 : i32
    %c0_i32_1 = arith.constant 0 : i32
    return %arg0, %c0_i32, %c0_i32_0 : i32, i32, i32
  }
  func.func @transform_1(%arg0: i32) -> (i32, i32, i32) {
    %c0_i32 = arith.constant 0 : i32
    %c0_i32_0 = arith.constant 0 : i32
    %c0_i32_1 = arith.constant 0 : i32
    %c0_i32_2 = arith.constant 0 : i32
    return %c0_i32, %c0_i32_0, %c0_i32_1 : i32, i32, i32
  }
  func.func @transform_2(%arg0: i32) -> (i32, i32, i32) {
    %c0_i32 = arith.constant 0 : i32
    %c0_i32_0 = arith.constant 0 : i32
    %c0_i32_1 = arith.constant 0 : i32
    %c0_i32_2 = arith.constant 0 : i32
    return %c0_i32, %c0_i32_0, %c0_i32_1 : i32, i32, i32
  }
  func.func @transform_3(%arg0: i32) -> (i32, i32, i32) {
    %c0_i32 = arith.constant 0 : i32
    %c0_i32_0 = arith.constant 0 : i32
    %c0_i32_1 = arith.constant 0 : i32
    %c0_i32_2 = arith.constant 0 : i32
    return %c0_i32, %c0_i32_0, %c0_i32_1 : i32, i32, i32
  }
  func.func @transform_4(%arg0: i32) -> (i32, i32, i32) {
    %c0_i32 = arith.constant 0 : i32
    %c0_i32_0 = arith.constant 0 : i32
    %c0_i32_1 = arith.constant 0 : i32
    %c0_i32_2 = arith.constant 0 : i32
    return %c0_i32, %c0_i32_0, %c0_i32_1 : i32, i32, i32
  }
  func.func @transform_5(%arg0: i32) -> (i32, i32, i32) {
    %c0_i32 = arith.constant 0 : i32
    %c0_i32_0 = arith.constant 0 : i32
    %c0_i32_1 = arith.constant 0 : i32
    %c0_i32_2 = arith.constant 0 : i32
    return %c0_i32, %c0_i32_0, %c0_i32_1 : i32, i32, i32
  }
  func.func @transform_6(%arg0: i32) -> (i32, i32, i32) {
    %c0_i32 = arith.constant 0 : i32
    %c0_i32_0 = arith.constant 0 : i32
    %c0_i32_1 = arith.constant 0 : i32
    %c0_i32_2 = arith.constant 0 : i32
    return %c0_i32, %c0_i32_0, %c0_i32_1 : i32, i32, i32
  }
  func.func @transform_7(%arg0: i32) -> (i32, i32, i32) {
    %c0_i32 = arith.constant 0 : i32
    %c0_i32_0 = arith.constant 0 : i32
    %c0_i32_1 = arith.constant 0 : i32
    %c0_i32_2 = arith.constant 0 : i32
    return %c0_i32, %c0_i32_0, %c0_i32_1 : i32, i32, i32
  }
  func.func @transform_8(%arg0: i32) -> (i32, i32, i32) {
    %c0_i32 = arith.constant 0 : i32
    %c0_i32_0 = arith.constant 0 : i32
    %c0_i32_1 = arith.constant 0 : i32
    return %arg0, %c0_i32, %c0_i32_0 : i32, i32, i32
  }
}

</mosaic_0001>

<bundles_post_ra>
// kernel: tpu_custom_call.1
= control target key start
LH: loop header
LB: loop body
LE: loop exit
PB: predicated region body
PF: predicated region fallthrough
CT: control target
= control target key end

     0   :  { %s1964_s0 = inlined_call_operand.hbm [shape: f32[2,8,32], index: 0, kind: input, shape index: {}]   ;;  %s1965_s1 = inlined_call_operand.vmem [shape: bf16[2,32,96], index: 1, kind: input, shape index: {}]   ;;  %s1966_s2 = inlined_call_operand.hbm [shape: f32[2,1,96], index: 2, kind: input, shape index: {}]   ;;  %s1967_s3 = inlined_call_operand.vmem [shape: bf16[2,32,32], index: 3, kind: input, shape index: {}]   ;;  %s1968_s4 = inlined_call_operand.vmem [shape: bf16[2,32,64], index: 4, kind: input, shape index: {}]   ;;  %s1969_s5 = inlined_call_operand.hbm [shape: f32[2,1,64], index: 5, kind: input, shape index: {}]   ;;  %s1970_s6 = inlined_call_operand.vmem [shape: bf16[2,64,32], index: 6, kind: input, shape index: {}]   ;;  %s1971_s7 = inlined_call_operand.vmem [shape: f32[2,6,32], index: 7, kind: input, shape index: {}]   ;;  %s1972_s8 = inlined_call_operand.hbm [shape: f32[2,8,32], index: 8, kind: output, shape index: {}]  }
   0x1   :  { %1973 = sst [smem:[#allocation13_spill]] %s1966_s2 }
   0x2   :  { %1974 = sst [smem:[#allocation14_spill]] %s1969_s5 }
   0x3   :  { %13 = vsyncpa [#allocation3], 0 }
   0x4   :  { %15 = vsyncpa [#allocation3 + $0x1], 0 }
   0x5   :  { %16 = vsyncpa [#allocation6], 0 }
   0x6   :  { %17 = vsyncpa [#allocation4], 0 }
   0x7   :  { %19 = vsyncpa [#allocation4 + $0x1], 0  ;;  %s1660_s27 = smov 0   ;;  %s1662_s28 = smov 0  }
   0x8   :  { %s1664_s29 = smov 0   ;;  %s1666_s30 = smov 0  }
   0x9 LB: > { %s1975_s2 = sld [smem:[#allocation13_spill]]  ;;  %s1684_s12 = sadd.s32 4294967295, %s1603_s30   ;;  %s1603_s30 = sphi %s1666_s30, %s1989_s30   ;;  %s1599_s29 = sphi %s1664_s29, %s1988_s29   ;;  %s1595_s28 = sphi %s1662_s28, %s1987_s28   ;;  %s1591_s27 = sphi %s1660_s27, %s1986_s27  }
   0xa   : > { %p1184_p0 = scmp.ge.s32.totalorder %s1603_s30, 1  ;;  %p46_p1 = scmp.eq.s32.totalorder %s1684_s12, 0 }
   0xb   : > { %p229_p2 = scmp.lt.s32.totalorder %s1603_s30, 3  ;;  %s1605_s14 = smov [#allocation5]  }
   0xc   : > { %s245_s15 = sshll.u32 %s1605_s14, 4  ;;  %s1977_s5 = sld [smem:[#allocation14_spill]]  ;;  %s246_s15 = int_to_ptr.vmem [resolvable:$true] %s245_s15 }
   0xd   : > { %p1689_p3 = pnand %p1184_p0, %p229_p2  ;;  %s1606_s19 = smov [#allocation7]  }
   0xe   : > { %s265_s20 = sshll.u32 %s1606_s19, 4  ;;  %s1607_s21 = smov 16   ;;  %s266_s20 = int_to_ptr.vmem [resolvable:$true] %s265_s20 }
   0xf   : > { %s243_s11 = sshll.u32 %s1975_s2, 4  ;;  %p1350_p4 = pneg %p1689_p3  ;;  %s244_s11 = int_to_ptr.hbm [resolvable:$true] %s243_s11 }
  0x10   : > { %s1608_s22 = smov 1   ;;  %s1183_s23 = sadd.s32 4294967294, %s1603_s30  }
  0x11   : > { %p1351_p6 = pnand %p1350_p4, %p46_p1  ;;  %s1703_s24 = sadd.s32 1, %s1603_s30  }
  0x12   : > { %s263_s18 = sshll.u32 %s1977_s5, 4  ;;  %s29_s25 = ssub.s32 %s1603_s30, %s1703_s24  ;;  %s264_s18 = int_to_ptr.hbm [resolvable:$true] %s263_s18 }
  0x13   : > { %1353 = dma.hbm_to_vmem [thread:$0]  (!%p1351_p6), %s244_s11, 32, %s246_s15, [#allocation6], %s1607_s21, %s1607_s21, %s1608_s22  }
  0x14   : > { %1356 = dma.hbm_to_vmem [thread:$0]  (!%p1351_p6), %s264_s18, 32, %s266_s20, [#allocation6], %s1607_s21, %s1607_s21, %s1608_s22  }
  0x15   : > { %s32_s26 = sadd.s32 1, %s1599_s29  ;;  %p30_p7 = scmp.eq.s32.totalorder %s29_s25, 0 }
  0x16   : > { %p39_p8 = scmp.ne.s32.totalorder %s1599_s29, %s1595_s28  ;;  %p40_p9 = scmp.eq.s32.totalorder %s1603_s30, 0 }
  0x17   : > { %p45_p10 = scmp.ne.s32.totalorder %s1595_s28, %s1591_s27  ;;  %p216_p13 = scmp.eq.s32.totalorder %s1684_s12, 1 }
  0x18   : > { %s1714_s9 = scalar_select %p30_p7, %s1599_s29, %s32_s26  }
  0x19   : > { %p1716_p11 = por %p40_p9, %p39_p8  ;;  %p1722_p12 = por %p46_p1, %p45_p10 }
  0x1a   : > { %1978 = sst [smem:[#allocation12_spill]] %s1714_s9  ;;  %p222_p0 = scmp.eq.s32.totalorder %s1183_s23, 1 }
  0x1b   : > { %p1367_p2 = scmp.lt.s32.totalorder %s1603_s30, 2  ;;  %s285_s14 = sand.u32 1, %s1599_s29  }
  0x1c   : > { %p1729_p4 = por %p216_p13, %p39_p8  ;;  %p1733_p6 = por %p222_p0, %p45_p10 }
  0x1d   : > { %s1188_s17 = sshll.u32 %s285_s14, 3  ;;  %s1189_s18 = sshll.u32 %s1603_s30, 3 }
  0x1e   : > { %s293_s21 = scalar_lea.hbm %s1964_s0, %s1189_s18  ;;  %s289_s22 = scalar_lea.vmem [#allocation2], %s1188_s17 }
  0x1f   : > { %s297_s25 = sshll.u32 %s289_s22, 4  ;;  %s295_s26 = sshll.u32 %s293_s21, 4  ;;  %s298_s25 = int_to_ptr.vmem [resolvable:$true] %s297_s25  ;;  %s296_s26 = int_to_ptr.hbm [resolvable:$true] %s295_s26 }
  0x20   : > { %p1743_p7 = pnand %p1367_p2, %p1716_p11  ;;  %s286_s2 = scalar_lea.sflag [#allocation3], %s285_s14 }
  0x21   : > { %s1503_s5 = sshra.s32 %s296_s26, 4  ;;  %s1510_s19 = scalar_lea.hbm %s1964_s0, 16  ;;  %s1504_s5 = int_to_ptr.hbm [resolvable:$true] %s1503_s5 }
  0x22   : > { %s1505_s9 = scalar_lea.hbm %s1504_s5, 8  ;;  %p1507_p9 = pneg %p1743_p7 }
  0x23   : > { %p1506_p8 = scmp.ne.s32.totalorder %s1504_s5, %s1505_s9  ;;  %p1511_p11 = scmp.lt.s32.totalorder %s1504_s5, %s1964_s0 }
  0x24   : > { %p1512_p0 = scmp.lt.s32.totalorder %s1510_s19, %s1505_s9 }
  0x25   : > { %p1508_p10 = pnand %p1507_p9, %p1506_p8 }
  0x26   : > { %p1513_p2 = por %p1512_p0, %p1511_p11 }
  0x27   : > { %p1509_p13 = pneg %p1508_p10 }
  0x29   : > { %p1514_p5 = pnand %p1513_p2, %p1509_p13 }
  0x2b   : > { %1517 = shalt.err (!%p1514_p5)
}
  0x2c   : > { %1360 = dma.hbm_to_vmem [thread:$0]  (!%p1743_p7), %s296_s26, 128, %s298_s25, %s286_s2  }
  0x2d   : > { %306 = sbr.rel (%p1689_p3) target bundleno = 3042 (0xbe2), region = 52  ;;  %s1760_s14 = sand.u32 (!%p1689_p3), 1, %s1595_s28  }
  0x2e   : > { %s1191_s21 = sshll.u32 (!%p1689_p3), %s1760_s14, 3  ;;  %s309_s22 = scalar_lea.sflag (!%p1689_p3), [#allocation3], %s1760_s14 }
  0x2f   : > { %s312_s5 = scalar_lea.vmem (!%p1689_p3), [#allocation2], %s1191_s21 }
  0x32   : > { %1578 = dma.done.wait (%p1722_p12), %s309_s22, 128  }
  0x33   : > { %1580 = vsyncadd (%p1722_p12), %s309_s22, 4294967168 }
  0x34   : > { %1582 = dma.done.wait (%p46_p1), [#allocation6], 64  }
  0x35   : > { %1584 = vsyncadd (%p46_p1), [#allocation6], 4294967232  ;;  %v1319_v0 = vld [vmem:[%s1965_s1 + $0x8] sm:$0xff]  ;;  %v1318_v1 = vld [vmem:[%s1965_s1] sm:$0xff]  ;;  %vm380_vm0 = vcmask 261120   ;;  %s1609_s11 = smov 112  }
  0x36   : > { %390 = vmatpush.bf16.msra.mxu0 %v1319_v0  ;;  %v1780_v2 = vld [vmem:[%s312_s5] sm:$0xff]  ;;  %v1413_v4 = vld [vmem:[#allocation5] ss:$0 sm:$0xff]  ;;  %s1610_s26 = smov 96   ;;  %s1611_s23 = smov 80   ;;  %vm405_vm1 = vcmask 130048  }
  0x37   : > { %v359_v3 = vpack.c.bf16 %v1780_v2, %v1780_v2  ;;  %s1612_s17 = smov 64   ;;  %s1613_s18 = smov 48   ;;  %vm444_vm2 = vcmask 1043456   ;;  %vm426_vm3 = vcmask 64512   ;;  %v1320_v44 = vld [vmem:[%s1967_s3] sm:$0xff]  ;;  %v1321_v45 = vld [vmem:[%s1967_s3 + $0x8] sm:$0xff] }
  0x38   : > { %v1813_v54 = vld [vmem:[%s1971_s7] sm:$0x3f]  ;;  %v1614_v0 = vmov 32.0   ;;  %vm674_vm8 = vcmask 523264   ;;  %s355_s9 = scalar_lea.vmem [#allocation8], %s1191_s21  ;;  %s1079_s19 = scalar_lea.sflag [#allocation4], %s1760_s14 }
  0x39   : > { %v564_v55 = vperm.slane %v1813_v54, 0  ;;  %s1091_s25 = sshll.u32 %s355_s9, 4  ;;  %s1553_s21 = scalar_lea.hbm %s1972_s8, 16  ;;  %s1092_s25 = int_to_ptr.vmem [resolvable:$true] %s1091_s25 }
  0x3a   : > { %391 = vmatpush.bf16.msra.mxu0 %v1318_v1 }
  0x3d   : > { %1203 = vmatmul.msk.bf16.vlgmr.msra.gmra.mxu0 %vm380_vm0, %v359_v3 }
  0x3e   : > { %536 = vmatpush.bf16.msrb.mxu0 %v1321_v45 }
  0xba   : > { %v393_v5 = vpop.f32.mrf.mxu0 }
  0xbb   : > { %v394_v6 = vadd.f32 %v1413_v4, %v393_v5 }
  0xbd   : > { %v401_v7 = vpack.c.bf16 %v394_v6, %v394_v6 }
  0xbf   : > { %462 = vrot.lane.b32.xlu1 %v401_v7, %s1609_s11  ;;  %403 = vrot.lane.b32.xlu0 %v401_v7, %s1610_s26 }
  0xc2   : > { %v395_v8 = vpop.f32.mrf.mxu0 }
  0xc7   : > { %464 = vrot.lane.b32.xlu0 %v401_v7, %s1611_s23 }
  0xcf   : > { %439 = vrot.lane.b32.xlu0 %v401_v7, %s1612_s17 }
  0xd7   : > { %498 = vrot.lane.b32.xlu0 %v401_v7, %s1613_s18 }
 0x131   : > { %v404_v9 = vpop.permute.xlu0 %403  ;;  %v463_v13 = vpop.permute.xlu1 %462 }
 0x132   : > { %v410_v10 = vsel %vm405_vm1, %v404_v9, 0 }
 0x133   : > { %419 = vmatpush.bf16.xpose.msra.mxu1 %v410_v10 }
 0x139   : > { %v465_v11 = vpop.permute.xlu0 %464 }
 0x13a   : > { %1204 = vmatmul.msk.bf16.vlgmr.msra.gmra.mxu1 %vm405_vm1, %v401_v7  ;;  %v470_v12 = vsel %vm405_vm1, %v465_v11, 0  ;;  %v1323_v7 = vld [vmem:[%s1968_s4 + $0x8] sm:$0xff] }
 0x13b   : > { %479 = vmatpush.bf16.xpose.msra.mxu3 %v470_v12  ;;  %558 = vmatpush.bf16.msrb.mxu1 %v1320_v44 }
 0x141   : > { %v440_v14 = vpop.permute.xlu0 %439 }
 0x142   : > { %1206 = vmatmul.msk.bf16.vlgmr.msra.gmra.mxu3 %vm405_vm1, %v463_v13  ;;  %v446_v15 = vsel %vm444_vm2, %v440_v14, 0  ;;  %v1327_v14 = vld [vmem:[%s1970_s6 + $0x18] sm:$0xff] }
 0x143   : > { %455 = vmatpush.bf16.msra.mxu2 %v446_v15  ;;  %632 = vmatpush.bf16.msrb.mxu3 %v1323_v7 }
 0x149   : > { %v499_v16 = vpop.permute.xlu0 %498 }
 0x14a   : > { %v504_v17 = vsel %vm444_vm2, %v499_v16, 0  ;;  %v1326_v16 = vld [vmem:[%s1970_s6 + $0x10] sm:$0xff] }
 0x14b   : > { %513 = vmatpush.bf16.msrb.mxu2 %v504_v17 }
 0x1b7   : > { %v421_v18 = vpop.f32.mrf.mxu1 }
 0x1b8   : > { %v425_v19 = vmul.f32 0.25, %v421_v18 }
 0x1ba   : > { %v427_v20 = vsel %vm426_vm3, %v425_v19, -inf }
 0x1bb   : > { %428 = vmax.xlane.f32.xlu1 %v427_v20 }
 0x1bf   : > { %v423_v21 = vpop.f32.mrf.mxu1 }
 0x1c5   : > { %v481_v22 = vpop.f32.mrf.mxu3 }
 0x1c6   : > { %v485_v23 = vmul.f32 0.25, %v481_v22 }
 0x1c8   : > { %v486_v24 = vsel %vm426_vm3, %v485_v23, -inf }
 0x1c9   : > { %487 = vmax.xlane.f32.xlu2 %v486_v24 }
 0x1cd   : > { %v483_v25 = vpop.f32.mrf.mxu3 }
 0x1ce   : > { %v598_v25 = vperm.slane %v1813_v54, 1 }
 0x22e   : > { %v429_v26 = vpop.xlane.xlu1 %428 }
 0x22f   : > { %v430_v27 = vsub.f32 %v425_v19, %v429_v26 }
 0x231   : > { %v431_v28 = vmul.f32 1.442695, %v430_v27 }
 0x233   : > { %1417 = vpow2.f32 %v431_v28  ;;  %v600_v28 = vperm.slane %v1813_v54, 2 }
 0x239   : > { %v1418_v29 = vpop.eup %1417 }
 0x23a   : > { %v433_v30 = vsel %vm426_vm3, %v1418_v29, 0.0 }
 0x23b   : > { %434 = vadd.xlane.f32.xlu2 %v433_v30 }
 0x23c   : > { %v488_v31 = vpop.xlane.xlu2 %487 }
 0x23d   : > { %v489_v32 = vsub.f32 %v485_v23, %v488_v31 }
 0x23f   : > { %v490_v33 = vmul.f32 1.442695, %v489_v32  ;;  %v1325_v32 = vld [vmem:[%s1970_s6 + $0x8] sm:$0xff] }
 0x241   : > { %1419 = vpow2.f32 %v490_v33  ;;  %v1324_v33 = vld [vmem:[%s1970_s6] sm:$0xff] }
 0x247   : > { %v1420_v34 = vpop.eup %1419 }
 0x248   : > { %v492_v35 = vsel %vm426_vm3, %v1420_v34, 0.0 }
 0x249   : > { %493 = vadd.xlane.f32.xlu2 %v492_v35 }
 0x2ae   : > { %v435_v36 = vpop.xlane.xlu2 %434 }
 0x2af   : > { %1421 = vrcp.f32 %v435_v36 }
 0x2b5   : > { %v1422_v37 = vpop.eup %1421 }
 0x2b6   : > { %v437_v38 = vmul.f32 %v1422_v37, %v1418_v29 }
 0x2b8   : > { %v438_v39 = vpack.c.bf16 %v437_v38, %v437_v38 }
 0x2ba   : > { %1205 = vmatmul.msk.bf16.vlgmr.msra.gmra.mxu2 %vm426_vm3, %v438_v39 }
 0x2bb   : > { %682 = vmatpush.bf16.msra.mxu2 %v1327_v14 }
 0x2bc   : > { %v494_v40 = vpop.xlane.xlu2 %493 }
 0x2bd   : > { %1423 = vrcp.f32 %v494_v40  ;;  %v649_v40 = vperm.slane %v1813_v54, 3 }
 0x2be   : > { %1425 = vrcp.f32 %v1614_v0 }
 0x2bf   : > { %683 = vmatpush.bf16.msra.mxu2 %v1326_v16 }
 0x2c3   : > { %v1424_v41 = vpop.eup %1423  ;;  %684 = vmatpush.bf16.msra.mxu2 %v1325_v32 }
 0x2c4   : > { %v496_v42 = vmul.f32 %v1424_v41, %v1420_v34  ;;  %v1426_v1 = vpop.eup %1425  ;;  %v1414_v34 = vld [vmem:[#allocation7] ss:$0 sm:$0xff] }
 0x2c5   : > { %v571_v3 = vmul.f32 32.0, %v1426_v1  ;;  %vm575_vm4 = vweird.f32 %v1426_v1 }
 0x2c6   : > { %v497_v43 = vpack.c.bf16 %v496_v42, %v496_v42 }
 0x2c7   : > { %v572_v4 = vsub.f32 1.0, %v571_v3  ;;  %685 = vmatpush.bf16.msra.mxu2 %v1324_v33 }
 0x2c9   : > { %v573_v5 = vmul.f32 %v1426_v1, %v572_v4 }
 0x2ca   : > { %1207 = vmatmul.msk.bf16.vlgmr.msrb.gmra.mxu2 %vm426_vm3, %v497_v43 }
 0x2cb   : > { %v574_v6 = vadd.f32 %v1426_v1, %v573_v5  ;;  %v718_v5 = vperm.slane %v1813_v54, 5 }
 0x2cd   : > { %v1825_v8 = vsel %vm575_vm4, %v1426_v1, %v574_v6  ;;  %v716_v1 = vperm.slane %v1813_v54, 4 }
 0x33d   : > { %v457_v46 = vpop.f32.mrf.mxu2 }
 0x33e   : > { %v461_v47 = vpack.c.bf16 %v457_v46, %v457_v46 }
 0x340   : > { %1217 = vmatmul.msk.bf16.vlgmr.msrb.gmra.mxu1 %vm405_vm1, %v461_v47 }
 0x345   : > { %v459_v48 = vpop.f32.mrf.mxu2 }
 0x34d   : > { %v515_v49 = vpop.f32.mrf.mxu2 }
 0x34e   : > { %v519_v50 = vpack.c.bf16 %v515_v49, %v515_v49  ;;  %v1329_v49 = vld [vmem:[%s1965_s1 + $0x18] sm:$0xff] }
 0x34f   : > { %754 = vmatpush.bf16.msra.mxu0 %v1329_v49  ;;  %v1331_v49 = vld [vmem:[%s1967_s3 + $0x18] sm:$0xff] }
 0x350   : > { %1212 = vmatmul.msk.bf16.vlgmr.msrb.gmra.mxu0 %vm405_vm1, %v519_v50  ;;  %v1328_v50 = vld [vmem:[%s1965_s1 + $0x10] sm:$0xff] }
 0x353   : > { %755 = vmatpush.bf16.msra.mxu0 %v1328_v50 }
 0x355   : > { %v517_v51 = vpop.f32.mrf.mxu2 }
 0x3bd   : > { %v560_v52 = vpop.f32.mrf.mxu1 }
 0x3c5   : > { %v562_v53 = vpop.f32.mrf.mxu1 }
 0x3cd   : > { %v538_v56 = vpop.f32.mrf.mxu0 }
 0x3ce   : > { %v561_v57 = vadd.f32 %v560_v52, %v538_v56 }
 0x3d0   : > { %v565_v58 = vadd.f32 %v564_v55, %v561_v57 }
 0x3d2   : > { %v566_v59 = vadd.f32 %v565_v58, %v1780_v2  ;;  %v1322_v2 = vld [vmem:[%s1968_s4] sm:$0xff] }
 0x3d3   : > { %633 = vmatpush.bf16.msrb.mxu3 %v1322_v2 }
 0x3d4   : > { %v567_v60 = vsel %vm380_vm0, %v566_v59, 0.0  ;;  %v578_v61 = vmul.f32 %v566_v59, %v566_v59 }
 0x3d5   : > { %568 = vadd.xlane.f32.xlu2 %v567_v60  ;;  %v540_v62 = vpop.f32.mrf.mxu0 }
 0x3d6   : > { %v579_v63 = vsel %vm380_vm0, %v578_v61, 0.0 }
 0x3d7   : > { %580 = vadd.xlane.f32.xlu0 %v579_v63 }
 0x448   : > { %v569_v9 = vpop.xlane.xlu2 %568 }
 0x449   : > { %v577_v10 = vmul.f32 %v1825_v8, %v569_v9  ;;  %v1415_v9 = vld [vmem:[#allocation5 + $0x1] ss:$0 sm:$0xff] }
 0x44a   : > { %v581_v11 = vpop.xlane.xlu0 %580 }
 0x44b   : > { %v583_v12 = vmul.f32 %v577_v10, %v577_v10  ;;  %v582_v13 = vmul.f32 %v581_v11, %v1825_v8  ;;  %v585_v24 = vsub.f32 %v566_v59, %v577_v10 }
 0x44d   : > { %v584_v15 = vsub.f32 %v582_v13, %v583_v12 }
 0x44f   : > { %v586_v17 = vadd.f32 1e-06, %v584_v15 }
 0x451   : > { %1427 = vrsqrt.f32 %v586_v17  ;;  %vm593_vm6 = vweird.f32 %v586_v17 }
 0x457   : > { %v1428_v18 = vpop.eup %1427 }
 0x458   : > { %v588_v19 = vmul.f32 %v1428_v18, %v586_v17  ;;  %vm594_vm5 = vweird.f32 %v1428_v18 }
 0x459   : > { %vm595_vm7 = vmor %vm593_vm6, %vm594_vm5 }
 0x45a   : > { %v589_v20 = vmul.f32 %v1428_v18, %v588_v19 }
 0x45c   : > { %v590_v21 = vmul.f32 0.5, %v589_v20 }
 0x45e   : > { %v591_v22 = vsub.f32 1.5, %v590_v21 }
 0x460   : > { %v592_v23 = vmul.f32 %v1428_v18, %v591_v22 }
 0x462   : > { %v596_v26 = vsel %vm595_vm7, %v1428_v18, %v592_v23 }
 0x463   : > { %v597_v27 = vmul.f32 %v596_v26, %v585_v24 }
 0x465   : > { %v599_v29 = vmul.f32 %v598_v25, %v597_v27 }
 0x467   : > { %v601_v30 = vadd.f32 %v600_v28, %v599_v29 }
 0x469   : > { %v602_v31 = vpack.c.bf16 %v601_v30, %v601_v30 }
 0x46b   : > { %1226 = vmatmul.msk.bf16.vlgmr.msrb.gmra.mxu3 %vm380_vm0, %v602_v31 }
 0x4ee   : > { %v635_v35 = vpop.f32.mrf.mxu3 }
 0x4ef   : > { %v636_v36 = vadd.f32 %v1414_v34, %v635_v35 }
 0x4f1   : > { %v639_v37 = vmax.f32 %v636_v36, 0.0 }
 0x4f3   : > { %v640_v38 = vpack.c.bf16 %v639_v37, %v639_v37 }
 0x4f5   : > { %1243 = vmatmul.msk.bf16.vlgmr.msra.gmra.mxu2 %vm674_vm8, %v640_v38 }
 0x4f6   : > { %v637_v39 = vpop.f32.mrf.mxu3 }
 0x578   : > { %v687_v41 = vpop.f32.mrf.mxu2 }
 0x579   : > { %v688_v42 = vadd.f32 %v687_v41, %v649_v40 }
 0x57b   : > { %v691_v43 = vadd.f32 %v688_v42, %v601_v30 }
 0x57d   : > { %v692_v44 = vsel %vm380_vm0, %v691_v43, 0.0  ;;  %v696_v46 = vmul.f32 %v691_v43, %v691_v43 }
 0x57e   : > { %693 = vadd.xlane.f32.xlu2 %v692_v44 }
 0x57f   : > { %v697_v47 = vsel %vm380_vm0, %v696_v46, 0.0 }
 0x580   : > { %v689_v45 = vpop.f32.mrf.mxu2 }
 0x586   : > { %698 = vadd.xlane.f32.xlu2 %v697_v47 }
 0x5f1   : > { %v694_v48 = vpop.xlane.xlu2 %693 }
 0x5f2   : > { %v695_v51 = vmul.f32 %v694_v48, %v1825_v8  ;;  %v1330_v48 = vld [vmem:[%s1967_s3 + $0x10] sm:$0xff] }
 0x5f4   : > { %v701_v53 = vmul.f32 %v695_v51, %v695_v51  ;;  %v703_v0 = vsub.f32 %v691_v43, %v695_v51 }
 0x5f9   : > { %v699_v52 = vpop.xlane.xlu2 %698 }
 0x5fa   : > { %v700_v55 = vmul.f32 %v699_v52, %v1825_v8 }
 0x5fc   : > { %v702_v56 = vsub.f32 %v700_v55, %v701_v53 }
 0x5fe   : > { %v704_v57 = vadd.f32 1e-06, %v702_v56 }
 0x600   : > { %1429 = vrsqrt.f32 %v704_v57  ;;  %vm711_vm10 = vweird.f32 %v704_v57 }
 0x606   : > { %v1430_v58 = vpop.eup %1429 }
 0x607   : > { %v706_v59 = vmul.f32 %v1430_v58, %v704_v57  ;;  %vm712_vm9 = vweird.f32 %v1430_v58 }
 0x608   : > { %vm713_vm11 = vmor %vm711_vm10, %vm712_vm9 }
 0x609   : > { %v707_v60 = vmul.f32 %v1430_v58, %v706_v59  ;;  %v1891_v59 = vld [vmem:[%s1971_s7 + $0x8] sm:$0x3f] }
 0x60b   : > { %v708_v61 = vmul.f32 0.5, %v707_v60  ;;  %v926_v60 = vperm.slane %v1891_v59, 0 }
 0x60d   : > { %v709_v62 = vsub.f32 1.5, %v708_v61 }
 0x60f   : > { %v710_v63 = vmul.f32 %v1430_v58, %v709_v62 }
 0x611   : > { %v714_v3 = vsel %vm713_vm11, %v1430_v58, %v710_v63 }
 0x612   : > { %v715_v4 = vmul.f32 %v714_v3, %v703_v0 }
 0x614   : > { %v717_v6 = vmul.f32 %v716_v1, %v715_v4 }
 0x616   : > { %v1858_v7 = vadd.f32 %v718_v5, %v717_v6 }
 0x618   : > { %v722_v2 = vpack.c.bf16 %v1858_v7, %v1858_v7 }
 0x61a   : > { %1257 = vmatmul.msk.bf16.vlgmr.msra.gmra.mxu0 %vm380_vm0, %v722_v2  ;;  %v1333_v2 = vld [vmem:[%s1968_s4 + $0x18] sm:$0xff] }
 0x697   : > { %v757_v10 = vpop.f32.mrf.mxu0 }
 0x698   : > { %v758_v11 = vadd.f32 %v1415_v9, %v757_v10  ;;  %v1332_v9 = vld [vmem:[%s1968_s4 + $0x10] sm:$0xff] }
 0x69a   : > { %v766_v12 = vpack.c.bf16 %v758_v11, %v758_v11 }
 0x69c   : > { %826 = vrot.lane.b32.xlu1 %v766_v12, %s1611_s23  ;;  %768 = vrot.lane.b32.xlu2 %v766_v12, %s1610_s26 }
 0x69f   : > { %v759_v13 = vpop.f32.mrf.mxu0 }
 0x6a0   : > { %v1337_v13 = vld [vmem:[%s1970_s6 + $0x38] sm:$0xff] }
 0x6a4   : > { %824 = vrot.lane.b32.xlu2 %v766_v12, %s1609_s11 }
 0x6f6   : > { %v769_v54 = vpop.permute.xlu2 %768 }
 0x6f7   : > { %v774_v14 = vsel %vm405_vm1, %v769_v54, 0 }
 0x6f8   : > { %783 = vmatpush.bf16.xpose.msra.mxu1 %v774_v14  ;;  %v1336_v14 = vld [vmem:[%s1970_s6 + $0x30] sm:$0xff] }
 0x6fe   : > { %v825_v17 = vpop.permute.xlu2 %824 }
 0x6ff   : > { %1262 = vmatmul.msk.bf16.vlgmr.msra.gmra.mxu1 %vm405_vm1, %v766_v12 }
 0x700   : > { %898 = vmatpush.bf16.msrb.mxu1 %v1331_v49 }
 0x70e   : > { %v827_v15 = vpop.permute.xlu1 %826 }
 0x70f   : > { %v832_v16 = vsel %vm405_vm1, %v827_v15, 0 }
 0x710   : > { %841 = vmatpush.bf16.xpose.msrb.mxu2 %v832_v16 }
 0x717   : > { %1264 = vmatmul.msk.bf16.vlgmr.msrb.gmra.mxu2 %vm405_vm1, %v825_v17 }
 0x718   : > { %989 = vmatpush.bf16.msra.mxu2 %v1333_v2 }
 0x71c   : > { %990 = vmatpush.bf16.msra.mxu2 %v1332_v9 }
 0x77c   : > { %v785_v18 = vpop.f32.mrf.mxu1 }
 0x77d   : > { %v789_v19 = vmul.f32 0.25, %v785_v18 }
 0x77f   : > { %v790_v20 = vsel %vm426_vm3, %v789_v19, -inf }
 0x780   : > { %791 = vmax.xlane.f32.xlu0 %v790_v20 }
 0x784   : > { %v787_v21 = vpop.f32.mrf.mxu1 }
 0x794   : > { %802 = vrot.lane.b32.xlu0 %v766_v12, %s1612_s17 }
 0x79a   : > { %v843_v22 = vpop.f32.mrf.mxu2 }
 0x79b   : > { %v847_v23 = vmul.f32 0.25, %v843_v22 }
 0x79d   : > { %v848_v24 = vsel %vm426_vm3, %v847_v23, -inf }
 0x79e   : > { %849 = vmax.xlane.f32.xlu1 %v848_v24 }
 0x7a2   : > { %v845_v25 = vpop.f32.mrf.mxu2 }
 0x7b7   : > { %860 = vrot.lane.b32.xlu1 %v766_v12, %s1613_s18  ;;  %s1315_s18 = sshll.u32 %s1684_s12, 3 }
 0x7b8   : > { %s1089_s13 = scalar_lea.hbm %s1972_s8, %s1315_s18 }
 0x7b9   : > { %s1093_s12 = sshll.u32 %s1089_s13, 4  ;;  %s1094_s12 = int_to_ptr.hbm [resolvable:$true] %s1093_s12 }
 0x7ba   : > { %s1547_s20 = sshra.s32 %s1094_s12, 4  ;;  %s1548_s20 = int_to_ptr.hbm [resolvable:$true] %s1547_s20 }
 0x7bb   : > { %s1549_s10 = scalar_lea.hbm %s1548_s20, 8  ;;  %p1554_p12 = scmp.lt.s32.totalorder %s1548_s20, %s1972_s8 }
 0x7bc   : > { %p1550_p1 = scmp.ne.s32.totalorder %s1548_s20, %s1549_s10  ;;  %p1555_p7 = scmp.lt.s32.totalorder %s1553_s21, %s1549_s10 }
 0x7be   : > { %p1551_p3 = pnand %p1550_p1, %p1729_p4  ;;  %p1556_p8 = por %p1555_p7, %p1554_p12 }
 0x7c0   : > { %p1552_p5 = pneg %p1551_p3 }
 0x7c2   : > { %p1557_p9 = pnand %p1556_p8, %p1552_p5 }
 0x7f3   : > { %v792_v26 = vpop.xlane.xlu0 %791 }
 0x7f4   : > { %v793_v27 = vsub.f32 %v789_v19, %v792_v26  ;;  %v955_v26 = vperm.slane %v1891_v59, 2 }
 0x7f6   : > { %v794_v28 = vmul.f32 1.442695, %v793_v27 }
 0x7f8   : > { %1431 = vpow2.f32 %v794_v28 }
 0x7fe   : > { %v1432_v29 = vpop.eup %1431 }
 0x7ff   : > { %v796_v30 = vsel %vm426_vm3, %v1432_v29, 0.0 }
 0x800   : > { %797 = vadd.xlane.f32.xlu2 %v796_v30  ;;  %v1335_v30 = vld [vmem:[%s1970_s6 + $0x28] sm:$0xff] }
 0x806   : > { %v803_v31 = vpop.permute.xlu0 %802 }
 0x807   : > { %v808_v32 = vsel %vm444_vm2, %v803_v31, 0  ;;  %v1334_v31 = vld [vmem:[%s1970_s6 + $0x20] sm:$0xff] }
 0x808   : > { %817 = vmatpush.bf16.msra.mxu3 %v808_v32  ;;  %v1416_v32 = vld [vmem:[#allocation7 + $0x1] ss:$0 sm:$0xff] }
 0x80c   : > { %920 = vmatpush.bf16.msrb.mxu3 %v1330_v48 }
 0x811   : > { %v850_v33 = vpop.xlane.xlu1 %849 }
 0x812   : > { %v851_v34 = vsub.f32 %v847_v23, %v850_v33  ;;  %v953_v23 = vperm.slane %v1891_v59, 1 }
 0x814   : > { %v852_v35 = vmul.f32 1.442695, %v851_v34 }
 0x816   : > { %1433 = vpow2.f32 %v852_v35 }
 0x81c   : > { %v1434_v36 = vpop.eup %1433 }
 0x81d   : > { %v854_v37 = vsel %vm426_vm3, %v1434_v36, 0.0 }
 0x81e   : > { %855 = vadd.xlane.f32.xlu0 %v854_v37 }
 0x829   : > { %v861_v38 = vpop.permute.xlu1 %860 }
 0x82a   : > { %v866_v39 = vsel %vm444_vm2, %v861_v38, 0  ;;  %v1007_v38 = vperm.slane %v1891_v59, 3 }
 0x82b   : > { %875 = vmatpush.bf16.msrb.mxu0 %v866_v39 }
 0x82f   : > { %1039 = vmatpush.bf16.msra.mxu0 %v1337_v13 }
 0x833   : > { %1040 = vmatpush.bf16.msra.mxu0 %v1336_v14 }
 0x837   : > { %1041 = vmatpush.bf16.msra.mxu0 %v1335_v30 }
 0x83b   : > { %1042 = vmatpush.bf16.msra.mxu0 %v1334_v31 }
 0x873   : > { %v798_v40 = vpop.xlane.xlu2 %797 }
 0x874   : > { %1435 = vrcp.f32 %v798_v40 }
 0x87a   : > { %v1436_v41 = vpop.eup %1435 }
 0x87b   : > { %v800_v42 = vmul.f32 %v1436_v41, %v1432_v29 }
 0x87d   : > { %v801_v43 = vpack.c.bf16 %v800_v42, %v800_v42 }
 0x87f   : > { %1263 = vmatmul.msk.bf16.vlgmr.msra.gmra.mxu3 %vm426_vm3, %v801_v43 }
 0x891   : > { %v856_v44 = vpop.xlane.xlu0 %855 }
 0x892   : > { %1437 = vrcp.f32 %v856_v44 }
 0x898   : > { %v1438_v45 = vpop.eup %1437 }
 0x899   : > { %v858_v46 = vmul.f32 %v1438_v45, %v1434_v36 }
 0x89b   : > { %v859_v47 = vpack.c.bf16 %v858_v46, %v858_v46 }
 0x89d   : > { %1265 = vmatmul.msk.bf16.vlgmr.msrb.gmra.mxu0 %vm426_vm3, %v859_v47 }
 0x902   : > { %v819_v50 = vpop.f32.mrf.mxu3 }
 0x903   : > { %v823_v51 = vpack.c.bf16 %v819_v50, %v819_v50 }
 0x905   : > { %1275 = vmatmul.msk.bf16.vlgmr.msrb.gmra.mxu3 %vm405_vm1, %v823_v51 }
 0x90a   : > { %v821_v52 = vpop.f32.mrf.mxu3 }
 0x91a   : > { %v877_v53 = vpop.f32.mrf.mxu0 }
 0x91b   : > { %v881_v55 = vpack.c.bf16 %v877_v53, %v877_v53 }
 0x91d   : > { %1270 = vmatmul.msk.bf16.vlgmr.msrb.gmra.mxu1 %vm405_vm1, %v881_v55 }
 0x922   : > { %v879_v56 = vpop.f32.mrf.mxu0 }
 0x988   : > { %v922_v57 = vpop.f32.mrf.mxu3 }
 0x990   : > { %v924_v58 = vpop.f32.mrf.mxu3 }
 0x99a   : > { %v900_v61 = vpop.f32.mrf.mxu1 }
 0x99b   : > { %v923_v62 = vadd.f32 %v922_v57, %v900_v61 }
 0x99d   : > { %v927_v63 = vadd.f32 %v926_v60, %v923_v62  ;;  %v1073_v62 = vperm.slane %v1891_v59, 4 }
 0x99f   : > { %v928_v0 = vadd.f32 %v927_v63, %v1858_v7 }
 0x9a1   : > { %v929_v1 = vsel %vm380_vm0, %v928_v0, 0.0  ;;  %v933_v4 = vmul.f32 %v928_v0, %v928_v0 }
 0x9a2   : > { %v902_v3 = vpop.f32.mrf.mxu1  ;;  %930 = vadd.xlane.f32.xlu2 %v929_v1 }
 0x9a3   : > { %v934_v5 = vsel %vm380_vm0, %v933_v4, 0.0 }
 0x9aa   : > { %935 = vadd.xlane.f32.xlu2 %v934_v5 }
 0xa15   : > { %v931_v6 = vpop.xlane.xlu2 %930 }
 0xa16   : > { %v932_v7 = vmul.f32 %v931_v6, %v1825_v8 }
 0xa18   : > { %v938_v11 = vmul.f32 %v932_v7, %v932_v7  ;;  %v940_v22 = vsub.f32 %v928_v0, %v932_v7  ;;  %v1075_v0 = vperm.slane %v1891_v59, 5 }
 0xa1d   : > { %v936_v10 = vpop.xlane.xlu2 %935 }
 0xa1e   : > { %v937_v12 = vmul.f32 %v936_v10, %v1825_v8 }
 0xa20   : > { %v939_v54 = vsub.f32 %v937_v12, %v938_v11 }
 0xa22   : > { %v941_v15 = vadd.f32 1e-06, %v939_v54 }
 0xa24   : > { %1439 = vrsqrt.f32 %v941_v15  ;;  %vm948_vm13 = vweird.f32 %v941_v15 }
 0xa2a   : > { %v1440_v16 = vpop.eup %1439 }
 0xa2b   : > { %v943_v17 = vmul.f32 %v1440_v16, %v941_v15  ;;  %vm949_vm12 = vweird.f32 %v1440_v16 }
 0xa2c   : > { %vm950_vm14 = vmor %vm948_vm13, %vm949_vm12 }
 0xa2d   : > { %v944_v18 = vmul.f32 %v1440_v16, %v943_v17 }
 0xa2f   : > { %v945_v19 = vmul.f32 0.5, %v944_v18 }
 0xa31   : > { %v946_v20 = vsub.f32 1.5, %v945_v19 }
 0xa33   : > { %v947_v21 = vmul.f32 %v1440_v16, %v946_v20 }
 0xa35   : > { %v951_v24 = vsel %vm950_vm14, %v1440_v16, %v947_v21 }
 0xa36   : > { %v952_v25 = vmul.f32 %v951_v24, %v940_v22 }
 0xa38   : > { %v954_v27 = vmul.f32 %v953_v23, %v952_v25 }
 0xa3a   : > { %v956_v28 = vadd.f32 %v955_v26, %v954_v27 }
 0xa3c   : > { %v957_v29 = vpack.c.bf16 %v956_v28, %v956_v28 }
 0xa3e   : > { %1288 = vmatmul.msk.bf16.vlgmr.msra.gmra.mxu2 %vm380_vm0, %v957_v29 }
 0xac1   : > { %v992_v33 = vpop.f32.mrf.mxu2 }
 0xac2   : > { %v993_v34 = vadd.f32 %v1416_v32, %v992_v33 }
 0xac4   : > { %v996_v35 = vmax.f32 %v993_v34, 0.0 }
 0xac6   : > { %v997_v36 = vpack.c.bf16 %v996_v35, %v996_v35 }
 0xac8   : > { %1313 = vmatmul.msk.bf16.vlgmr.msra.gmra.mxu0 %vm674_vm8, %v997_v36 }
 0xac9   : > { %v994_v37 = vpop.f32.mrf.mxu2 }
 0xb45   : > { %v1044_v39 = vpop.f32.mrf.mxu0 }
 0xb46   : > { %v1045_v40 = vadd.f32 %v1044_v39, %v1007_v38 }
 0xb48   : > { %v1048_v41 = vadd.f32 %v1045_v40, %v956_v28 }
 0xb4a   : > { %v1049_v42 = vsel %vm380_vm0, %v1048_v41, 0.0  ;;  %v1053_v43 = vmul.f32 %v1048_v41, %v1048_v41 }
 0xb4b   : > { %1050 = vadd.xlane.f32.xlu2 %v1049_v42 }
 0xb4c   : > { %v1054_v44 = vsel %vm380_vm0, %v1053_v43, 0.0 }
 0xb4d   : > { %v1046_v45 = vpop.f32.mrf.mxu0  ;;  %1055 = vadd.xlane.f32.xlu1 %v1054_v44 }
 0xbbe   : > { %v1051_v46 = vpop.xlane.xlu2 %1050 }
 0xbbf   : > { %v1052_v47 = vmul.f32 %v1051_v46, %v1825_v8 }
 0xbc0   : > { %v1056_v48 = vpop.xlane.xlu1 %1055 }
 0xbc1   : > { %v1058_v49 = vmul.f32 %v1052_v47, %v1052_v47  ;;  %v1057_v50 = vmul.f32 %v1056_v48, %v1825_v8  ;;  %v1060_v61 = vsub.f32 %v1048_v41, %v1052_v47 }
 0xbc3   : > { %v1059_v51 = vsub.f32 %v1057_v50, %v1058_v49 }
 0xbc5   : > { %v1061_v52 = vadd.f32 1e-06, %v1059_v51 }
 0xbc7   : > { %1441 = vrsqrt.f32 %v1061_v52  ;;  %vm1068_vm1 = vweird.f32 %v1061_v52 }
 0xbcd   : > { %v1442_v53 = vpop.eup %1441 }
 0xbce   : > { %v1063_v55 = vmul.f32 %v1442_v53, %v1061_v52  ;;  %vm1069_vm15 = vweird.f32 %v1442_v53 }
 0xbcf   : > { %vm1070_vm2 = vmor %vm1068_vm1, %vm1069_vm15 }
 0xbd0   : > { %v1064_v56 = vmul.f32 %v1442_v53, %v1063_v55 }
 0xbd2   : > { %v1065_v57 = vmul.f32 0.5, %v1064_v56 }
 0xbd4   : > { %v1066_v58 = vsub.f32 1.5, %v1065_v57 }
 0xbd6   : > { %v1067_v60 = vmul.f32 %v1442_v53, %v1066_v58 }
 0xbd8   : > { %v1071_v8 = vsel %vm1070_vm2, %v1442_v53, %v1067_v60 }
 0xbd9   : > { %v1072_v63 = vmul.f32 %v1071_v8, %v1060_v61 }
 0xbdb   : > { %v1074_v1 = vmul.f32 %v1073_v62, %v1072_v63 }
 0xbdd   : > { %v1076_v3 = vadd.f32 %v1075_v0, %v1074_v1 }
 0xbdf   : > { %1077 = vst.msk [vmem:[%s355_s9] sm:$0xff] %vm380_vm0, %v1076_v3 }
 0xbe0   : > { %1560 = shalt.err (!%p1557_p9)
}
 0xbe1   : > { %1348 = dma.vmem_to_hbm [thread:$0]  (%p1729_p4), %s1092_s25, 128, %s1094_s12, %s1079_s19  }
 0xbe2 PF: > { %s1105_s14 = sand.u32 1, %s1591_s27   ;;  %p1984_p10 = scmp.ge.s32.totalorder %s1603_s30, 2 }
 0xbe3   : > { %s1106_s17 = scalar_lea.sflag [#allocation4], %s1105_s14 }
 0xbe4   : > { %p1362_p13 = pnand %p1984_p10, %p1733_p6 }
 0xbe6   : > { %p1363_p11 = pneg %p1362_p13 }
 0xbe8   : > { %1586 = dma.done.wait (%p1363_p11), %s1106_s17, 128  }
 0xbe9   : > { %1588 = vsyncadd (%p1363_p11), %s1106_s17, 4294967168  ;;  %s1985_s18 = sld [smem:[#allocation12_spill]]  ;;  %p22_p0 = scmp.ge.s32.totalorder %s1703_s24, 4  }
 0xbea   : > { %s1986_s27 = smov %s1595_s28  ;;  %s1987_s28 = smov %s1599_s29 }
 0xbeb   : > { %s1989_s30 = smov %s1703_s24  ;;  %24 = sbr.rel (!%p22_p0) target bundleno = 9 (0x9), region = 112 }
 0xbef   : > { %s1988_s29 = smov %s1985_s18 }
 0xbf0   :  { %1112 = vsyncpa [#allocation3], 1 }
 0xbf1   :  { %1114 = vsyncpa [#allocation3 + $0x1], 1 }
 0xbf2   :  { %1115 = vsyncpa [#allocation6], 1 }
 0xbf3   :  { %1116 = vsyncpa [#allocation4], 1 }
 0xbf4   :  { %1118 = vsyncpa [#allocation4 + $0x1], 1 }

</bundles_post_ra>
